<compile_context>
chip_gen: v5e
topology: v5e:2x2
jax: 0.10.0
libtpu: 0.0.40
codegen_flags: <defaults>
</compile_context>

<pallas_src>
import functools

import jax
import jax.numpy as jnp
from jax.experimental import pallas as pl
from jax.experimental.pallas import tpu as pltpu

# ----------------------------- configuration -------------------------------
FEAT_DIM = 512          # hard-coded 512 in the PyTorch module (fc_input)
EMBED_DIM = 32          # embedding_dim (small for the demo; module default 256)
HIDDEN_DIM = 32         # hidden_dim   (small for the demo; module default 256)
VOCAB_SIZE = 64
BATCH = 2
SEQ_LEN = 8
IMG_C, IMG_H, IMG_W = 3, 16, 16

LANE = 128              # TPU lane width; vocab dim padded to a multiple of it


def _round_up(x, m):
    return (x + m - 1) // m * m


# ------------------------------ Pallas kernel -------------------------------
def _scst_kernel(B, T, E, H,
                 feat_ref,     # (B, 512)      image features                  f32
                 emb_ref,      # (T*B, E)      caption embeddings (time-major) f32
                 w_inf_ref,    # (512, E)      fc_input weight, feature half   bf16
                 w_ine_ref,    # (E, E)        fc_input weight, embedding half bf16
                 b_in_ref,     # (1, E)        fc_input bias                   f32
                 w_ih_ref,     # (E, 4H)       LSTM input weights [i,f,g,o]    bf16
                 w_hh_ref,     # (H, 4H)       LSTM hidden weights             f32
                 b_lstm_ref,   # (1, 4H)       b_ih + b_hh                     f32
                 w_fc_ref,     # (H, tile_v)   output projection (vocab tile)  bf16
                 b_fc_ref,     # (1, tile_v)   output bias (vocab tile)        f32
                 out_ref,      # (B*T, tile_v) logits, batch-major rows        f32
                 h_scratch):   # VMEM (B*T, H) hidden states, batch-major      f32
    # ---- recurrence: only on the first vocab tile; h persists in VMEM ----
    @pl.when(pl.program_id(0) == 0)
    def _recurrence():
        bf16 = jnp.bfloat16
        f32 = jnp.float32

        # fc_input, split into feature / embedding halves.  The feature half
        # is computed once per sequence (no T-fold replication of features).
        feat_x = jnp.dot(feat_ref[...].astype(bf16), w_inf_ref[...],
                         preferred_element_type=f32) + b_in_ref[...]          # (B, E)
        emb_x = jnp.dot(emb_ref[...].astype(bf16), w_ine_ref[...],
                        preferred_element_type=f32)                           # (T*B, E)

        # Hoist the input-side LSTM matmul out of the serial recurrence:
        # one (T*B, 4H) matmul instead of T small ones inside the loop.
        feat_g = jnp.dot(feat_x.astype(bf16), w_ih_ref[...],
                         preferred_element_type=f32) + b_lstm_ref[...]        # (B, 4H)
        emb_g = jnp.dot(emb_x.astype(bf16), w_ih_ref[...],
                        preferred_element_type=f32)                           # (T*B, 4H)
        xw = emb_g + jnp.tile(feat_g, (T, 1))                                 # (T*B, 4H), time-major

        w_hh = w_hh_ref[...]                                                  # serial path stays f32
        h = jnp.zeros((B, H), f32)
        c = jnp.zeros((B, H), f32)
        hs = []
        # T is small and static: fully unroll.
        for t in range(T):
            gates = xw[t * B:(t + 1) * B, :] + jnp.dot(
                h, w_hh, preferred_element_type=f32)                          # (B, 4H)
            # 4H == 128 lanes -> one vreg row: apply sigmoid/tanh once to the
            # full row, then slice the gates (2 EUP passes instead of 4).
            sig = jax.nn.sigmoid(gates)
            tnh = jnp.tanh(gates)
            i_g = sig[:, 0 * H:1 * H]
            f_g = sig[:, 1 * H:2 * H]
            g_g = tnh[:, 2 * H:3 * H]
            o_g = sig[:, 3 * H:4 * H]
            c = f_g * c + i_g * g_g
            h = o_g * jnp.tanh(c)
            hs.append(h)

        # Stash all hidden states batch-major (row = b*T + t) with ONE bulk
        # store, so logits come out directly in (B, T, V) row order and the
        # wrapper never transposes.
        h_scratch[...] = jnp.concatenate(
            [hs[t][b:b + 1, :] for b in range(B) for t in range(T)], axis=0)

    # ---- vocab projection: one (B*T, H) @ (H, tile_v) matmul per vocab tile,
    # single lane-dense bulk store (no per-timestep masked (B, V) stores). ----
    logits = jnp.dot(h_scratch[...].astype(jnp.bfloat16), w_fc_ref[...],
                     preferred_element_type=jnp.float32) + b_fc_ref[...]
    out_ref[...] = logits


def scst_logits_pallas(features, emb_tb, params, *, B, T, E, H, V):
    """features: (B, 512) f32; emb_tb: (T*B, E) f32 time-major -> (B, T, V) f32."""
    F = FEAT_DIM
    V_pad = _round_up(max(V, LANE), LANE)
    tile_v = 512 if V_pad % 512 == 0 else (256 if V_pad % 256 == 0 else 128)
    n_v_tiles = V_pad // tile_v

    # Split fc_input weight into feature / embedding halves (mathematically
    # identical to the concat-then-matmul of the PyTorch module), cast the
    # non-recurrent matmul weights to bf16 for the MXU (f32 accumulation in
    # kernel), and zero-pad the vocab dim to a lane-dense multiple of 128.
    w_in = params["w_in"]
    w_in_feat = w_in[:F].astype(jnp.bfloat16)
    w_in_emb = w_in[F:].astype(jnp.bfloat16)
    w_ih = params["w_ih"].astype(jnp.bfloat16)
    w_fc = jnp.pad(params["w_fc"].astype(jnp.bfloat16), ((0, 0), (0, V_pad - V)))
    b_fc = jnp.pad(params["b_fc"], ((0, 0), (0, V_pad - V)))

    kernel = functools.partial(_scst_kernel, B, T, E, H)
    out = pl.pallas_call(
        kernel,
        out_shape=jax.ShapeDtypeStruct((B * T, V_pad), jnp.float32),
        grid_spec=pltpu.PrefetchScalarGridSpec(
            num_scalar_prefetch=0,
            grid=(n_v_tiles,),
            in_specs=[
                pl.BlockSpec((B, F), lambda v: (0, 0)),        # features
                pl.BlockSpec((T * B, E), lambda v: (0, 0)),    # caption embeddings
                pl.BlockSpec((F, E), lambda v: (0, 0)),        # w_in feature half
                pl.BlockSpec((E, E), lambda v: (0, 0)),        # w_in embedding half
                pl.BlockSpec((1, E), lambda v: (0, 0)),        # b_in
                pl.BlockSpec((E, 4 * H), lambda v: (0, 0)),    # w_ih
                pl.BlockSpec((H, 4 * H), lambda v: (0, 0)),    # w_hh
                pl.BlockSpec((1, 4 * H), lambda v: (0, 0)),    # b_ih + b_hh
                pl.BlockSpec((H, tile_v), lambda v: (0, v)),   # w_fc vocab tile
                pl.BlockSpec((1, tile_v), lambda v: (0, v)),   # b_fc vocab tile
            ],
            out_specs=pl.BlockSpec((B * T, tile_v), lambda v: (0, v)),
            scratch_shapes=[pltpu.VMEM((B * T, H), jnp.float32)],
        ),
        compiler_params=pltpu.CompilerParams(
            # The recurrence runs at vocab-tile 0; later tiles reuse its hidden
            # states from VMEM scratch, so this axis must stay sequential.
            dimension_semantics=("arbitrary",),
        ),
    )(features, emb_tb, w_in_feat, w_in_emb, params["b_in"], w_ih,
      params["w_hh"], params["b_lstm"], w_fc, b_fc)

    # (B*T, V_pad) batch-major -> (B, T, V): reshape is free, slice drops pad.
    return out.reshape(B, T, V_pad)[:, :, :V]


# ------------------------------- JAX glue -----------------------------------
def init_params(key, vocab=VOCAB_SIZE, E=EMBED_DIM, H=HIDDEN_DIM, F=FEAT_DIM):
    ks = jax.random.split(key, 10)
    s = 0.05
    return {
        # TODO(synk): resnet18 backbone replaced by avg-pool + linear stand-in.
        "w_cnn":  s * jax.random.normal(ks[0], (IMG_C, F), jnp.float32),
        "b_cnn":  s * jax.random.normal(ks[1], (1, F), jnp.float32),
        "embed":  s * jax.random.normal(ks[2], (vocab, E), jnp.float32),
        "w_in":   s * jax.random.normal(ks[3], (F + E, E), jnp.float32),
        "b_in":   s * jax.random.normal(ks[4], (1, E), jnp.float32),
        "w_ih":   s * jax.random.normal(ks[5], (E, 4 * H), jnp.float32),
        "w_hh":   s * jax.random.normal(ks[6], (H, 4 * H), jnp.float32),
        "b_lstm": s * jax.random.normal(ks[7], (1, 4 * H), jnp.float32),
        "w_fc":   s * jax.random.normal(ks[8], (H, vocab), jnp.float32),
        "b_fc":   s * jax.random.normal(ks[9], (1, vocab), jnp.float32),
    }


def scst_forward(images, captions, params):
    """images: (B, 3, H, W) float32 NCHW; captions: (B, T) int32."""
    B, T = captions.shape
    E, H, V = EMBED_DIM, HIDDEN_DIM, VOCAB_SIZE

    # TODO(synk): resnet18 pretrained backbone has no in-script equivalent;
    # stand-in = global average pool + linear projection to 512 features.
    pooled = jnp.mean(images, axis=(2, 3))                      # (B, 3)
    features = pooled @ params["w_cnn"] + params["b_cnn"]       # (B, 512)

    # Embedding lookup gathered directly in time-major order (T*B, E): the
    # kernel's per-timestep rows are contiguous and no (B,T,512+E) concat /
    # feature replication is ever materialized.
    emb_tb = jnp.take(params["embed"], captions.T.reshape(T * B), axis=0)

    # TODO(synk): critic head exists in the module but is unused by forward().
    return scst_logits_pallas(features, emb_tb, params, B=B, T=T, E=E, H=H, V=V)


# --------------------------------- main --------------------------------------
if __name__ == "__main__":
    key = jax.random.PRNGKey(0)
    k_img, k_cap, k_par = jax.random.split(key, 3)

    images = jax.random.normal(k_img, (BATCH, IMG_C, IMG_H, IMG_W), jnp.float32)
    captions = jax.random.randint(k_cap, (BATCH, SEQ_LEN), 0, VOCAB_SIZE,
                                  dtype=jnp.int32)
    params = init_params(k_par)

    logits = jax.jit(scst_forward)(images, captions, params)
    jax.block_until_ready(logits)

    assert logits.shape == (BATCH, SEQ_LEN, VOCAB_SIZE)
    assert bool(jnp.all(jnp.isfinite(logits)))
    print("KERNEL_OK")
</pallas_src>

<mosaic_0001>
module attributes {stable_mosaic.version = 11 : i64} {
  func.func @_scst_kernel(%arg0: i32, %arg1: memref<2x512xf32, #tpu.memory_space<vmem>>, %arg2: memref<16x32xf32, #tpu.memory_space<vmem>>, %arg3: memref<512x32xbf16, #tpu.memory_space<vmem>>, %arg4: memref<32x32xbf16, #tpu.memory_space<vmem>>, %arg5: memref<1x32xf32, #tpu.memory_space<vmem>>, %arg6: memref<32x128xbf16, #tpu.memory_space<vmem>>, %arg7: memref<32x128xf32, #tpu.memory_space<vmem>>, %arg8: memref<1x128xf32, #tpu.memory_space<vmem>>, %arg9: memref<32x128xbf16, #tpu.memory_space<vmem>>, %arg10: memref<1x128xf32, #tpu.memory_space<vmem>>, %arg11: memref<16x128xf32, #tpu.memory_space<vmem>>, %arg12: memref<16x32xf32, #tpu.memory_space<vmem>>) attributes {dimension_semantics = [#tpu.dimension_semantics<arbitrary>], iteration_bounds = array<i64: 1>, scalar_prefetch = 0 : i64, scratch_operands = 1 : i64, tpu.core_type = #tpu.core_type<tc>, window_params = [{pipeline_mode = #tpu.pipeline_mode<synchronous>, transform_indices = @transform_0, window_bounds = array<i64: 2, 512>}, {pipeline_mode = #tpu.pipeline_mode<synchronous>, transform_indices = @transform_1, window_bounds = array<i64: 16, 32>}, {pipeline_mode = #tpu.pipeline_mode<synchronous>, transform_indices = @transform_2, window_bounds = array<i64: 512, 32>}, {pipeline_mode = #tpu.pipeline_mode<synchronous>, transform_indices = @transform_3, window_bounds = array<i64: 32, 32>}, {pipeline_mode = #tpu.pipeline_mode<synchronous>, transform_indices = @transform_4, window_bounds = array<i64: 1, 32>}, {pipeline_mode = #tpu.pipeline_mode<synchronous>, transform_indices = @transform_5, window_bounds = array<i64: 32, 128>}, {pipeline_mode = #tpu.pipeline_mode<synchronous>, transform_indices = @transform_6, window_bounds = array<i64: 32, 128>}, {pipeline_mode = #tpu.pipeline_mode<synchronous>, transform_indices = @transform_7, window_bounds = array<i64: 1, 128>}, {transform_indices = @transform_8, window_bounds = array<i64: 32, 128>}, {transform_indices = @transform_9, window_bounds = array<i64: 1, 128>}, {transform_indices = @transform_10, window_bounds = array<i64: 16, 128>}]} {
    %c0_i32 = arith.constant 0 : i32
    %0 = arith.cmpi eq, %arg0, %c0_i32 : i32
    %1 = arith.extui %0 : i1 to i32
    %c0_i32_0 = arith.constant 0 : i32
    %2 = arith.cmpi ne, %1, %c0_i32_0 : i32
    scf.if %2 {
      %c0_8 = arith.constant 0 : index
      %c0_9 = arith.constant 0 : index
      %11 = vector.load %arg1[%c0_8, %c0_9] : memref<2x512xf32, #tpu.memory_space<vmem>>, vector<2x512xf32>
      %12 = arith.truncf %11 : vector<2x512xf32> to vector<2x512xbf16>
      %c0_10 = arith.constant 0 : index
      %c0_11 = arith.constant 0 : index
      %13 = vector.load %arg3[%c0_10, %c0_11] : memref<512x32xbf16, #tpu.memory_space<vmem>>, vector<512x32xbf16>
      %cst_12 = arith.constant dense<0.000000e+00> : vector<2x32xf32>
      %14 = tpu.matmul %12, %13, %cst_12 {dimension_numbers = #tpu.dot_dimension_numbers<[1], [0], [0], [1], [0, 0, 1, 1], [], []>} : vector<2x512xbf16>, vector<512x32xbf16>, vector<2x32xf32> -> vector<2x32xf32>
      %c0_13 = arith.constant 0 : index
      %c0_14 = arith.constant 0 : index
      %15 = vector.load %arg5[%c0_13, %c0_14] : memref<1x32xf32, #tpu.memory_space<vmem>>, vector<1x32xf32>
      %16 = vector.broadcast %15 : vector<1x32xf32> to vector<2x32xf32>
      %17 = arith.addf %14, %16 : vector<2x32xf32>
      %c0_15 = arith.constant 0 : index
      %c0_16 = arith.constant 0 : index
      %18 = vector.load %arg2[%c0_15, %c0_16] : memref<16x32xf32, #tpu.memory_space<vmem>>, vector<16x32xf32>
      %19 = arith.truncf %18 : vector<16x32xf32> to vector<16x32xbf16>
      %c0_17 = arith.constant 0 : index
      %c0_18 = arith.constant 0 : index
      %20 = vector.load %arg4[%c0_17, %c0_18] : memref<32x32xbf16, #tpu.memory_space<vmem>>, vector<32x32xbf16>
      %cst_19 = arith.constant dense<0.000000e+00> : vector<16x32xf32>
      %21 = tpu.matmul %19, %20, %cst_19 {dimension_numbers = #tpu.dot_dimension_numbers<[1], [0], [0], [1], [0, 0, 1, 1], [], []>} : vector<16x32xbf16>, vector<32x32xbf16>, vector<16x32xf32> -> vector<16x32xf32>
      %22 = arith.truncf %17 : vector<2x32xf32> to vector<2x32xbf16>
      %c0_20 = arith.constant 0 : index
      %c0_21 = arith.constant 0 : index
      %23 = vector.load %arg6[%c0_20, %c0_21] : memref<32x128xbf16, #tpu.memory_space<vmem>>, vector<32x128xbf16>
      %cst_22 = arith.constant dense<0.000000e+00> : vector<2x128xf32>
      %24 = tpu.matmul %22, %23, %cst_22 {dimension_numbers = #tpu.dot_dimension_numbers<[1], [0], [0], [1], [0, 0, 1, 1], [], []>} : vector<2x32xbf16>, vector<32x128xbf16>, vector<2x128xf32> -> vector<2x128xf32>
      %c0_23 = arith.constant 0 : index
      %c0_24 = arith.constant 0 : index
      %25 = vector.load %arg8[%c0_23, %c0_24] : memref<1x128xf32, #tpu.memory_space<vmem>>, vector<1x128xf32>
      %26 = vector.broadcast %25 : vector<1x128xf32> to vector<2x128xf32>
      %27 = arith.addf %24, %26 : vector<2x128xf32>
      %28 = arith.truncf %21 : vector<16x32xf32> to vector<16x32xbf16>
      %c0_25 = arith.constant 0 : index
      %c0_26 = arith.constant 0 : index
      %29 = vector.load %arg6[%c0_25, %c0_26] : memref<32x128xbf16, #tpu.memory_space<vmem>>, vector<32x128xbf16>
      %cst_27 = arith.constant dense<0.000000e+00> : vector<16x128xf32>
      %30 = tpu.matmul %28, %29, %cst_27 {dimension_numbers = #tpu.dot_dimension_numbers<[1], [0], [0], [1], [0, 0, 1, 1], [], []>} : vector<16x32xbf16>, vector<32x128xbf16>, vector<16x128xf32> -> vector<16x128xf32>
      %31 = tpu.concatenate %27, %27, %27, %27, %27, %27, %27, %27 in 0 : vector<2x128xf32>, vector<2x128xf32>, vector<2x128xf32>, vector<2x128xf32>, vector<2x128xf32>, vector<2x128xf32>, vector<2x128xf32>, vector<2x128xf32> -> vector<16x128xf32>
      %32 = arith.addf %30, %31 : vector<16x128xf32>
      %c0_28 = arith.constant 0 : index
      %c0_29 = arith.constant 0 : index
      %33 = vector.load %arg7[%c0_28, %c0_29] : memref<32x128xf32, #tpu.memory_space<vmem>>, vector<32x128xf32>
      %cst_30 = arith.constant 0.000000e+00 : f32
      %34 = vector.broadcast %cst_30 : f32 to vector<2x32xf32>
      %cst_31 = arith.constant 0.000000e+00 : f32
      %35 = vector.broadcast %cst_31 : f32 to vector<2x32xf32>
      %36 = vector.extract_strided_slice %32 {offsets = [0, 0], sizes = [2, 128], strides = [1, 1]} : vector<16x128xf32> to vector<2x128xf32>
      %cst_32 = arith.constant dense<0.000000e+00> : vector<2x128xf32>
      %37 = tpu.matmul %34, %33, %cst_32 {dimension_numbers = #tpu.dot_dimension_numbers<[1], [0], [0], [1], [0, 0, 1, 1], [], []>} : vector<2x32xf32>, vector<32x128xf32>, vector<2x128xf32> -> vector<2x128xf32>
      %38 = arith.addf %36, %37 : vector<2x128xf32>
      %39 = arith.negf %38 : vector<2x128xf32>
      %40 = math.exp %39 : vector<2x128xf32>
      %cst_33 = arith.constant 1.000000e+00 : f32
      %41 = vector.broadcast %cst_33 : f32 to vector<2x128xf32>
      %42 = arith.addf %41, %40 : vector<2x128xf32>
      %43 = arith.divf %41, %42 : vector<2x128xf32>
      %44 = math.tanh %38 : vector<2x128xf32>
      %45 = vector.extract_strided_slice %43 {offsets = [0, 0], sizes = [2, 32], strides = [1, 1]} : vector<2x128xf32> to vector<2x32xf32>
      %46 = vector.extract_strided_slice %43 {offsets = [0, 32], sizes = [2, 32], strides = [1, 1]} : vector<2x128xf32> to vector<2x32xf32>
      %47 = vector.extract_strided_slice %44 {offsets = [0, 64], sizes = [2, 32], strides = [1, 1]} : vector<2x128xf32> to vector<2x32xf32>
      %48 = vector.extract_strided_slice %43 {offsets = [0, 96], sizes = [2, 32], strides = [1, 1]} : vector<2x128xf32> to vector<2x32xf32>
      %49 = arith.mulf %46, %35 : vector<2x32xf32>
      %50 = arith.mulf %45, %47 : vector<2x32xf32>
      %51 = arith.addf %49, %50 : vector<2x32xf32>
      %52 = math.tanh %51 : vector<2x32xf32>
      %53 = arith.mulf %48, %52 : vector<2x32xf32>
      %54 = vector.extract_strided_slice %32 {offsets = [2, 0], sizes = [2, 128], strides = [1, 1]} : vector<16x128xf32> to vector<2x128xf32>
      %cst_34 = arith.constant dense<0.000000e+00> : vector<2x128xf32>
      %55 = tpu.matmul %53, %33, %cst_34 {dimension_numbers = #tpu.dot_dimension_numbers<[1], [0], [0], [1], [0, 0, 1, 1], [], []>} : vector<2x32xf32>, vector<32x128xf32>, vector<2x128xf32> -> vector<2x128xf32>
      %56 = arith.addf %54, %55 : vector<2x128xf32>
      %57 = arith.negf %56 : vector<2x128xf32>
      %58 = math.exp %57 : vector<2x128xf32>
      %cst_35 = arith.constant 1.000000e+00 : f32
      %59 = vector.broadcast %cst_35 : f32 to vector<2x128xf32>
      %60 = arith.addf %59, %58 : vector<2x128xf32>
      %61 = arith.divf %59, %60 : vector<2x128xf32>
      %62 = math.tanh %56 : vector<2x128xf32>
      %63 = vector.extract_strided_slice %61 {offsets = [0, 0], sizes = [2, 32], strides = [1, 1]} : vector<2x128xf32> to vector<2x32xf32>
      %64 = vector.extract_strided_slice %61 {offsets = [0, 32], sizes = [2, 32], strides = [1, 1]} : vector<2x128xf32> to vector<2x32xf32>
      %65 = vector.extract_strided_slice %62 {offsets = [0, 64], sizes = [2, 32], strides = [1, 1]} : vector<2x128xf32> to vector<2x32xf32>
      %66 = vector.extract_strided_slice %61 {offsets = [0, 96], sizes = [2, 32], strides = [1, 1]} : vector<2x128xf32> to vector<2x32xf32>
      %67 = arith.mulf %64, %51 : vector<2x32xf32>
      %68 = arith.mulf %63, %65 : vector<2x32xf32>
      %69 = arith.addf %67, %68 : vector<2x32xf32>
      %70 = math.tanh %69 : vector<2x32xf32>
      %71 = arith.mulf %66, %70 : vector<2x32xf32>
      %72 = vector.extract_strided_slice %32 {offsets = [4, 0], sizes = [2, 128], strides = [1, 1]} : vector<16x128xf32> to vector<2x128xf32>
      %cst_36 = arith.constant dense<0.000000e+00> : vector<2x128xf32>
      %73 = tpu.matmul %71, %33, %cst_36 {dimension_numbers = #tpu.dot_dimension_numbers<[1], [0], [0], [1], [0, 0, 1, 1], [], []>} : vector<2x32xf32>, vector<32x128xf32>, vector<2x128xf32> -> vector<2x128xf32>
      %74 = arith.addf %72, %73 : vector<2x128xf32>
      %75 = arith.negf %74 : vector<2x128xf32>
      %76 = math.exp %75 : vector<2x128xf32>
      %cst_37 = arith.constant 1.000000e+00 : f32
      %77 = vector.broadcast %cst_37 : f32 to vector<2x128xf32>
      %78 = arith.addf %77, %76 : vector<2x128xf32>
      %79 = arith.divf %77, %78 : vector<2x128xf32>
      %80 = math.tanh %74 : vector<2x128xf32>
      %81 = vector.extract_strided_slice %79 {offsets = [0, 0], sizes = [2, 32], strides = [1, 1]} : vector<2x128xf32> to vector<2x32xf32>
      %82 = vector.extract_strided_slice %79 {offsets = [0, 32], sizes = [2, 32], strides = [1, 1]} : vector<2x128xf32> to vector<2x32xf32>
      %83 = vector.extract_strided_slice %80 {offsets = [0, 64], sizes = [2, 32], strides = [1, 1]} : vector<2x128xf32> to vector<2x32xf32>
      %84 = vector.extract_strided_slice %79 {offsets = [0, 96], sizes = [2, 32], strides = [1, 1]} : vector<2x128xf32> to vector<2x32xf32>
      %85 = arith.mulf %82, %69 : vector<2x32xf32>
      %86 = arith.mulf %81, %83 : vector<2x32xf32>
      %87 = arith.addf %85, %86 : vector<2x32xf32>
      %88 = math.tanh %87 : vector<2x32xf32>
      %89 = arith.mulf %84, %88 : vector<2x32xf32>
      %90 = vector.extract_strided_slice %32 {offsets = [6, 0], sizes = [2, 128], strides = [1, 1]} : vector<16x128xf32> to vector<2x128xf32>
      %cst_38 = arith.constant dense<0.000000e+00> : vector<2x128xf32>
      %91 = tpu.matmul %89, %33, %cst_38 {dimension_numbers = #tpu.dot_dimension_numbers<[1], [0], [0], [1], [0, 0, 1, 1], [], []>} : vector<2x32xf32>, vector<32x128xf32>, vector<2x128xf32> -> vector<2x128xf32>
      %92 = arith.addf %90, %91 : vector<2x128xf32>
      %93 = arith.negf %92 : vector<2x128xf32>
      %94 = math.exp %93 : vector<2x128xf32>
      %cst_39 = arith.constant 1.000000e+00 : f32
      %95 = vector.broadcast %cst_39 : f32 to vector<2x128xf32>
      %96 = arith.addf %95, %94 : vector<2x128xf32>
      %97 = arith.divf %95, %96 : vector<2x128xf32>
      %98 = math.tanh %92 : vector<2x128xf32>
      %99 = vector.extract_strided_slice %97 {offsets = [0, 0], sizes = [2, 32], strides = [1, 1]} : vector<2x128xf32> to vector<2x32xf32>
      %100 = vector.extract_strided_slice %97 {offsets = [0, 32], sizes = [2, 32], strides = [1, 1]} : vector<2x128xf32> to vector<2x32xf32>
      %101 = vector.extract_strided_slice %98 {offsets = [0, 64], sizes = [2, 32], strides = [1, 1]} : vector<2x128xf32> to vector<2x32xf32>
      %102 = vector.extract_strided_slice %97 {offsets = [0, 96], sizes = [2, 32], strides = [1, 1]} : vector<2x128xf32> to vector<2x32xf32>
      %103 = arith.mulf %100, %87 : vector<2x32xf32>
      %104 = arith.mulf %99, %101 : vector<2x32xf32>
      %105 = arith.addf %103, %104 : vector<2x32xf32>
      %106 = math.tanh %105 : vector<2x32xf32>
      %107 = arith.mulf %102, %106 : vector<2x32xf32>
      %108 = vector.extract_strided_slice %32 {offsets = [8, 0], sizes = [2, 128], strides = [1, 1]} : vector<16x128xf32> to vector<2x128xf32>
      %cst_40 = arith.constant dense<0.000000e+00> : vector<2x128xf32>
      %109 = tpu.matmul %107, %33, %cst_40 {dimension_numbers = #tpu.dot_dimension_numbers<[1], [0], [0], [1], [0, 0, 1, 1], [], []>} : vector<2x32xf32>, vector<32x128xf32>, vector<2x128xf32> -> vector<2x128xf32>
      %110 = arith.addf %108, %109 : vector<2x128xf32>
      %111 = arith.negf %110 : vector<2x128xf32>
      %112 = math.exp %111 : vector<2x128xf32>
      %cst_41 = arith.constant 1.000000e+00 : f32
      %113 = vector.broadcast %cst_41 : f32 to vector<2x128xf32>
      %114 = arith.addf %113, %112 : vector<2x128xf32>
      %115 = arith.divf %113, %114 : vector<2x128xf32>
      %116 = math.tanh %110 : vector<2x128xf32>
      %117 = vector.extract_strided_slice %115 {offsets = [0, 0], sizes = [2, 32], strides = [1, 1]} : vector<2x128xf32> to vector<2x32xf32>
      %118 = vector.extract_strided_slice %115 {offsets = [0, 32], sizes = [2, 32], strides = [1, 1]} : vector<2x128xf32> to vector<2x32xf32>
      %119 = vector.extract_strided_slice %116 {offsets = [0, 64], sizes = [2, 32], strides = [1, 1]} : vector<2x128xf32> to vector<2x32xf32>
      %120 = vector.extract_strided_slice %115 {offsets = [0, 96], sizes = [2, 32], strides = [1, 1]} : vector<2x128xf32> to vector<2x32xf32>
      %121 = arith.mulf %118, %105 : vector<2x32xf32>
      %122 = arith.mulf %117, %119 : vector<2x32xf32>
      %123 = arith.addf %121, %122 : vector<2x32xf32>
      %124 = math.tanh %123 : vector<2x32xf32>
      %125 = arith.mulf %120, %124 : vector<2x32xf32>
      %126 = vector.extract_strided_slice %32 {offsets = [10, 0], sizes = [2, 128], strides = [1, 1]} : vector<16x128xf32> to vector<2x128xf32>
      %cst_42 = arith.constant dense<0.000000e+00> : vector<2x128xf32>
      %127 = tpu.matmul %125, %33, %cst_42 {dimension_numbers = #tpu.dot_dimension_numbers<[1], [0], [0], [1], [0, 0, 1, 1], [], []>} : vector<2x32xf32>, vector<32x128xf32>, vector<2x128xf32> -> vector<2x128xf32>
      %128 = arith.addf %126, %127 : vector<2x128xf32>
      %129 = arith.negf %128 : vector<2x128xf32>
      %130 = math.exp %129 : vector<2x128xf32>
      %cst_43 = arith.constant 1.000000e+00 : f32
      %131 = vector.broadcast %cst_43 : f32 to vector<2x128xf32>
      %132 = arith.addf %131, %130 : vector<2x128xf32>
      %133 = arith.divf %131, %132 : vector<2x128xf32>
      %134 = math.tanh %128 : vector<2x128xf32>
      %135 = vector.extract_strided_slice %133 {offsets = [0, 0], sizes = [2, 32], strides = [1, 1]} : vector<2x128xf32> to vector<2x32xf32>
      %136 = vector.extract_strided_slice %133 {offsets = [0, 32], sizes = [2, 32], strides = [1, 1]} : vector<2x128xf32> to vector<2x32xf32>
      %137 = vector.extract_strided_slice %134 {offsets = [0, 64], sizes = [2, 32], strides = [1, 1]} : vector<2x128xf32> to vector<2x32xf32>
      %138 = vector.extract_strided_slice %133 {offsets = [0, 96], sizes = [2, 32], strides = [1, 1]} : vector<2x128xf32> to vector<2x32xf32>
      %139 = arith.mulf %136, %123 : vector<2x32xf32>
      %140 = arith.mulf %135, %137 : vector<2x32xf32>
      %141 = arith.addf %139, %140 : vector<2x32xf32>
      %142 = math.tanh %141 : vector<2x32xf32>
      %143 = arith.mulf %138, %142 : vector<2x32xf32>
      %144 = vector.extract_strided_slice %32 {offsets = [12, 0], sizes = [2, 128], strides = [1, 1]} : vector<16x128xf32> to vector<2x128xf32>
      %cst_44 = arith.constant dense<0.000000e+00> : vector<2x128xf32>
      %145 = tpu.matmul %143, %33, %cst_44 {dimension_numbers = #tpu.dot_dimension_numbers<[1], [0], [0], [1], [0, 0, 1, 1], [], []>} : vector<2x32xf32>, vector<32x128xf32>, vector<2x128xf32> -> vector<2x128xf32>
      %146 = arith.addf %144, %145 : vector<2x128xf32>
      %147 = arith.negf %146 : vector<2x128xf32>
      %148 = math.exp %147 : vector<2x128xf32>
      %cst_45 = arith.constant 1.000000e+00 : f32
      %149 = vector.broadcast %cst_45 : f32 to vector<2x128xf32>
      %150 = arith.addf %149, %148 : vector<2x128xf32>
      %151 = arith.divf %149, %150 : vector<2x128xf32>
      %152 = math.tanh %146 : vector<2x128xf32>
      %153 = vector.extract_strided_slice %151 {offsets = [0, 0], sizes = [2, 32], strides = [1, 1]} : vector<2x128xf32> to vector<2x32xf32>
      %154 = vector.extract_strided_slice %151 {offsets = [0, 32], sizes = [2, 32], strides = [1, 1]} : vector<2x128xf32> to vector<2x32xf32>
      %155 = vector.extract_strided_slice %152 {offsets = [0, 64], sizes = [2, 32], strides = [1, 1]} : vector<2x128xf32> to vector<2x32xf32>
      %156 = vector.extract_strided_slice %151 {offsets = [0, 96], sizes = [2, 32], strides = [1, 1]} : vector<2x128xf32> to vector<2x32xf32>
      %157 = arith.mulf %154, %141 : vector<2x32xf32>
      %158 = arith.mulf %153, %155 : vector<2x32xf32>
      %159 = arith.addf %157, %158 : vector<2x32xf32>
      %160 = math.tanh %159 : vector<2x32xf32>
      %161 = arith.mulf %156, %160 : vector<2x32xf32>
      %162 = vector.extract_strided_slice %32 {offsets = [14, 0], sizes = [2, 128], strides = [1, 1]} : vector<16x128xf32> to vector<2x128xf32>
      %cst_46 = arith.constant dense<0.000000e+00> : vector<2x128xf32>
      %163 = tpu.matmul %161, %33, %cst_46 {dimension_numbers = #tpu.dot_dimension_numbers<[1], [0], [0], [1], [0, 0, 1, 1], [], []>} : vector<2x32xf32>, vector<32x128xf32>, vector<2x128xf32> -> vector<2x128xf32>
      %164 = arith.addf %162, %163 : vector<2x128xf32>
      %165 = arith.negf %164 : vector<2x128xf32>
      %166 = math.exp %165 : vector<2x128xf32>
      %cst_47 = arith.constant 1.000000e+00 : f32
      %167 = vector.broadcast %cst_47 : f32 to vector<2x128xf32>
      %168 = arith.addf %167, %166 : vector<2x128xf32>
      %169 = arith.divf %167, %168 : vector<2x128xf32>
      %170 = math.tanh %164 : vector<2x128xf32>
      %171 = vector.extract_strided_slice %169 {offsets = [0, 0], sizes = [2, 32], strides = [1, 1]} : vector<2x128xf32> to vector<2x32xf32>
      %172 = vector.extract_strided_slice %169 {offsets = [0, 32], sizes = [2, 32], strides = [1, 1]} : vector<2x128xf32> to vector<2x32xf32>
      %173 = vector.extract_strided_slice %170 {offsets = [0, 64], sizes = [2, 32], strides = [1, 1]} : vector<2x128xf32> to vector<2x32xf32>
      %174 = vector.extract_strided_slice %169 {offsets = [0, 96], sizes = [2, 32], strides = [1, 1]} : vector<2x128xf32> to vector<2x32xf32>
      %175 = arith.mulf %172, %159 : vector<2x32xf32>
      %176 = arith.mulf %171, %173 : vector<2x32xf32>
      %177 = arith.addf %175, %176 : vector<2x32xf32>
      %178 = math.tanh %177 : vector<2x32xf32>
      %179 = arith.mulf %174, %178 : vector<2x32xf32>
      %180 = vector.extract_strided_slice %53 {offsets = [0, 0], sizes = [1, 32], strides = [1, 1]} : vector<2x32xf32> to vector<1x32xf32>
      %181 = vector.extract_strided_slice %71 {offsets = [0, 0], sizes = [1, 32], strides = [1, 1]} : vector<2x32xf32> to vector<1x32xf32>
      %182 = vector.extract_strided_slice %89 {offsets = [0, 0], sizes = [1, 32], strides = [1, 1]} : vector<2x32xf32> to vector<1x32xf32>
      %183 = vector.extract_strided_slice %107 {offsets = [0, 0], sizes = [1, 32], strides = [1, 1]} : vector<2x32xf32> to vector<1x32xf32>
      %184 = vector.extract_strided_slice %125 {offsets = [0, 0], sizes = [1, 32], strides = [1, 1]} : vector<2x32xf32> to vector<1x32xf32>
      %185 = vector.extract_strided_slice %143 {offsets = [0, 0], sizes = [1, 32], strides = [1, 1]} : vector<2x32xf32> to vector<1x32xf32>
      %186 = vector.extract_strided_slice %161 {offsets = [0, 0], sizes = [1, 32], strides = [1, 1]} : vector<2x32xf32> to vector<1x32xf32>
      %187 = vector.extract_strided_slice %179 {offsets = [0, 0], sizes = [1, 32], strides = [1, 1]} : vector<2x32xf32> to vector<1x32xf32>
      %188 = vector.extract_strided_slice %53 {offsets = [1, 0], sizes = [1, 32], strides = [1, 1]} : vector<2x32xf32> to vector<1x32xf32>
      %189 = vector.extract_strided_slice %71 {offsets = [1, 0], sizes = [1, 32], strides = [1, 1]} : vector<2x32xf32> to vector<1x32xf32>
      %190 = vector.extract_strided_slice %89 {offsets = [1, 0], sizes = [1, 32], strides = [1, 1]} : vector<2x32xf32> to vector<1x32xf32>
      %191 = vector.extract_strided_slice %107 {offsets = [1, 0], sizes = [1, 32], strides = [1, 1]} : vector<2x32xf32> to vector<1x32xf32>
      %192 = vector.extract_strided_slice %125 {offsets = [1, 0], sizes = [1, 32], strides = [1, 1]} : vector<2x32xf32> to vector<1x32xf32>
      %193 = vector.extract_strided_slice %143 {offsets = [1, 0], sizes = [1, 32], strides = [1, 1]} : vector<2x32xf32> to vector<1x32xf32>
      %194 = vector.extract_strided_slice %161 {offsets = [1, 0], sizes = [1, 32], strides = [1, 1]} : vector<2x32xf32> to vector<1x32xf32>
      %195 = vector.extract_strided_slice %179 {offsets = [1, 0], sizes = [1, 32], strides = [1, 1]} : vector<2x32xf32> to vector<1x32xf32>
      %196 = tpu.concatenate %180, %181, %182, %183, %184, %185, %186, %187, %188, %189, %190, %191, %192, %193, %194, %195 in 0 : vector<1x32xf32>, vector<1x32xf32>, vector<1x32xf32>, vector<1x32xf32>, vector<1x32xf32>, vector<1x32xf32>, vector<1x32xf32>, vector<1x32xf32>, vector<1x32xf32>, vector<1x32xf32>, vector<1x32xf32>, vector<1x32xf32>, vector<1x32xf32>, vector<1x32xf32>, vector<1x32xf32>, vector<1x32xf32> -> vector<16x32xf32>
      %c0_48 = arith.constant 0 : index
      %c0_49 = arith.constant 0 : index
      %197 = vector.load %arg12[%c0_48, %c0_49] : memref<16x32xf32, #tpu.memory_space<vmem>>, vector<16x32xf32>
      tpu.vector_store %arg12[%c0_48, %c0_49], %196 {strides = array<i32>} : memref<16x32xf32, #tpu.memory_space<vmem>>, vector<16x32xf32>,
    } else {
    }
    %c0 = arith.constant 0 : index
    %c0_1 = arith.constant 0 : index
    %3 = vector.load %arg12[%c0, %c0_1] : memref<16x32xf32, #tpu.memory_space<vmem>>, vector<16x32xf32>
    %4 = arith.truncf %3 : vector<16x32xf32> to vector<16x32xbf16>
    %c0_2 = arith.constant 0 : index
    %c0_3 = arith.constant 0 : index
    %5 = vector.load %arg9[%c0_2, %c0_3] : memref<32x128xbf16, #tpu.memory_space<vmem>>, vector<32x128xbf16>
    %cst = arith.constant dense<0.000000e+00> : vector<16x128xf32>
    %6 = tpu.matmul %4, %5, %cst {dimension_numbers = #tpu.dot_dimension_numbers<[1], [0], [0], [1], [0, 0, 1, 1], [], []>} : vector<16x32xbf16>, vector<32x128xbf16>, vector<16x128xf32> -> vector<16x128xf32>
    %c0_4 = arith.constant 0 : index
    %c0_5 = arith.constant 0 : index
    %7 = vector.load %arg10[%c0_4, %c0_5] : memref<1x128xf32, #tpu.memory_space<vmem>>, vector<1x128xf32>
    %8 = vector.broadcast %7 : vector<1x128xf32> to vector<16x128xf32>
    %9 = arith.addf %6, %8 : vector<16x128xf32>
    %c0_6 = arith.constant 0 : index
    %c0_7 = arith.constant 0 : index
    %10 = vector.load %arg11[%c0_6, %c0_7] : memref<16x128xf32, #tpu.memory_space<vmem>>, vector<16x128xf32>
    tpu.vector_store %arg11[%c0_6, %c0_7], %9 {strides = array<i32>} : memref<16x128xf32, #tpu.memory_space<vmem>>, vector<16x128xf32>,
    return
  }
  func.func @transform_0(%arg0: i32) -> (i32, i32) {
    %c0_i32 = arith.constant 0 : i32
    %c0_i32_0 = arith.constant 0 : i32
    %c0_i32_1 = arith.constant 0 : i32
    return %c0_i32, %c0_i32_0 : i32, i32
  }
  func.func @transform_1(%arg0: i32) -> (i32, i32) {
    %c0_i32 = arith.constant 0 : i32
    %c0_i32_0 = arith.constant 0 : i32
    %c0_i32_1 = arith.constant 0 : i32
    return %c0_i32, %c0_i32_0 : i32, i32
  }
  func.func @transform_2(%arg0: i32) -> (i32, i32) {
    %c0_i32 = arith.constant 0 : i32
    %c0_i32_0 = arith.constant 0 : i32
    %c0_i32_1 = arith.constant 0 : i32
    return %c0_i32, %c0_i32_0 : i32, i32
  }
  func.func @transform_3(%arg0: i32) -> (i32, i32) {
    %c0_i32 = arith.constant 0 : i32
    %c0_i32_0 = arith.constant 0 : i32
    %c0_i32_1 = arith.constant 0 : i32
    return %c0_i32, %c0_i32_0 : i32, i32
  }
  func.func @transform_4(%arg0: i32) -> (i32, i32) {
    %c0_i32 = arith.constant 0 : i32
    %c0_i32_0 = arith.constant 0 : i32
    %c0_i32_1 = arith.constant 0 : i32
    return %c0_i32, %c0_i32_0 : i32, i32
  }
  func.func @transform_5(%arg0: i32) -> (i32, i32) {
    %c0_i32 = arith.constant 0 : i32
    %c0_i32_0 = arith.constant 0 : i32
    %c0_i32_1 = arith.constant 0 : i32
    return %c0_i32, %c0_i32_0 : i32, i32
  }
  func.func @transform_6(%arg0: i32) -> (i32, i32) {
    %c0_i32 = arith.constant 0 : i32
    %c0_i32_0 = arith.constant 0 : i32
    %c0_i32_1 = arith.constant 0 : i32
    return %c0_i32, %c0_i32_0 : i32, i32
  }
  func.func @transform_7(%arg0: i32) -> (i32, i32) {
    %c0_i32 = arith.constant 0 : i32
    %c0_i32_0 = arith.constant 0 : i32
    %c0_i32_1 = arith.constant 0 : i32
    return %c0_i32, %c0_i32_0 : i32, i32
  }
  func.func @transform_8(%arg0: i32) -> (i32, i32) {
    %c0_i32 = arith.constant 0 : i32
    %c0_i32_0 = arith.constant 0 : i32
    return %c0_i32, %arg0 : i32, i32
  }
  func.func @transform_9(%arg0: i32) -> (i32, i32) {
    %c0_i32 = arith.constant 0 : i32
    %c0_i32_0 = arith.constant 0 : i32
    return %c0_i32, %arg0 : i32, i32
  }
  func.func @transform_10(%arg0: i32) -> (i32, i32) {
    %c0_i32 = arith.constant 0 : i32
    %c0_i32_0 = arith.constant 0 : i32
    return %c0_i32, %arg0 : i32, i32
  }
}

</mosaic_0001>

<bundles_post_ra>
// kernel: scst_forward.1
= control target key start
LH: loop header
LB: loop body
LE: loop exit
PB: predicated region body
PF: predicated region fallthrough
CT: control target
= control target key end

     0   :  { %s1772_s0 = inlined_call_operand.vmem [shape: f32[2,512], index: 0, kind: input, shape index: {}]   ;;  %s1773_s1 = inlined_call_operand.vmem [shape: f32[16,32], index: 1, kind: input, shape index: {}]   ;;  %s1774_s2 = inlined_call_operand.vmem [shape: bf16[512,32], index: 2, kind: input, shape index: {}]   ;;  %s1775_s3 = inlined_call_operand.vmem [shape: bf16[32,32], index: 3, kind: input, shape index: {}]   ;;  %s1776_s4 = inlined_call_operand.vmem [shape: f32[1,32], index: 4, kind: input, shape index: {}]   ;;  %s1777_s5 = inlined_call_operand.vmem [shape: bf16[32,128], index: 5, kind: input, shape index: {}]   ;;  %s1778_s6 = inlined_call_operand.vmem [shape: f32[32,128], index: 6, kind: input, shape index: {}]   ;;  %s1779_s7 = inlined_call_operand.vmem [shape: f32[1,128], index: 7, kind: input, shape index: {}]   ;;  %s1780_s8 = inlined_call_operand.vmem [shape: bf16[32,128], index: 8, kind: input, shape index: {}]   ;;  %s1781_s9 = inlined_call_operand.vmem [shape: f32[1,128], index: 9, kind: input, shape index: {}]   ;;  %s1782_s10 = inlined_call_operand.hbm [shape: f32[16,128], index: 10, kind: output, shape index: {}]  }
   0x1   :  { %v1318_v0 = vld [vmem:[%s1774_s2 + $0x38] sm:$0xff]  ;;  %v1317_v4 = vld [vmem:[%s1774_s2 + $0x30] sm:$0xff]  ;;  %v1316_v8 = vld [vmem:[%s1774_s2 + $0x28] sm:$0xff] }
   0x2   :  { %v1334_v1 = vld [vmem:[%s1774_s2 + $0xb8] sm:$0xff]  ;;  %316 = vmatpush.bf16.msra.mxu0 %v1318_v0  ;;  %v1333_v5 = vld [vmem:[%s1774_s2 + $0xb0] sm:$0xff]  ;;  %v1332_v9 = vld [vmem:[%s1774_s2 + $0xa8] sm:$0xff] }
   0x3   :  { %v1326_v2 = vld [vmem:[%s1774_s2 + $0x78] sm:$0xff]  ;;  %342 = vmatpush.bf16.msra.mxu2 %v1334_v1  ;;  %v1325_v6 = vld [vmem:[%s1774_s2 + $0x70] sm:$0xff]  ;;  %v1324_v10 = vld [vmem:[%s1774_s2 + $0x68] sm:$0xff] }
   0x4   :  { %v1342_v3 = vld [vmem:[%s1774_s2 + $0xf8] sm:$0xff]  ;;  %329 = vmatpush.bf16.msra.mxu1 %v1326_v2  ;;  %v1341_v7 = vld [vmem:[%s1774_s2 + $0xf0] sm:$0xff]  ;;  %v1340_v11 = vld [vmem:[%s1774_s2 + $0xe8] sm:$0xff] }
   0x5   :  { %355 = vmatpush.bf16.msra.mxu3 %v1342_v3  ;;  %v1315_v12 = vld [vmem:[%s1774_s2 + $0x20] sm:$0xff] }
   0x6   :  { %317 = vmatpush.bf16.msra.mxu0 %v1317_v4  ;;  %v1331_v13 = vld [vmem:[%s1774_s2 + $0xa0] sm:$0xff] }
   0x7   :  { %343 = vmatpush.bf16.msra.mxu2 %v1333_v5  ;;  %v41_v14 = vld [vmem:[%s1772_s0] sm:$0xff] }
   0x8   :  { %330 = vmatpush.bf16.msra.mxu1 %v1325_v6  ;;  %v1323_v15 = vld [vmem:[%s1774_s2 + $0x60] sm:$0xff]  ;;  %43 = vst [vmem:[#allocation1] ss:$4 sm:$0xff] %v41_v14 }
   0x9   :  { %356 = vmatpush.bf16.msra.mxu3 %v1341_v7  ;;  %v1339_v16 = vld [vmem:[%s1774_s2 + $0xe0] sm:$0xff] }
   0xa   :  { %318 = vmatpush.bf16.msra.mxu0 %v1316_v8 }
   0xb   :  { %344 = vmatpush.bf16.msra.mxu2 %v1332_v9 }
   0xc   :  { %331 = vmatpush.bf16.msra.mxu1 %v1324_v10 }
   0xd   :  { %357 = vmatpush.bf16.msra.mxu3 %v1340_v11 }
   0xe   :  { %15 = vsyncpa [#allocation4], 0  ;;  %319 = vmatpush.bf16.msra.mxu0 %v1315_v12  ;;  %v1314_v17 = vld [vmem:[%s1774_s2 + $0x18] sm:$0xff]  ;;  %v1313_v21 = vld [vmem:[%s1774_s2 + $0x10] sm:$0xff]  ;;  %vm387_vm0 = vcmask 261120   ;;  %v1448_v52 = vmov 0.0  }
   0xf   :  { %345 = vmatpush.bf16.msra.mxu2 %v1331_v13  ;;  %v1330_v18 = vld [vmem:[%s1774_s2 + $0x98] sm:$0xff]  ;;  %v1329_v22 = vld [vmem:[%s1774_s2 + $0x90] sm:$0xff]  ;;  %v1312_v25 = vld [vmem:[%s1774_s2 + $0x8] sm:$0xff]  ;;  %vm450_vm1 = vcmask 1041408   ;;  %vm452_vm2 = vcmask 1043456   ;;  %vm454_vm3 = vcmask 1045504  }
  0x10   :  { %332 = vmatpush.bf16.msra.mxu1 %v1323_v15  ;;  %v1322_v19 = vld [vmem:[%s1774_s2 + $0x58] sm:$0xff]  ;;  %v1321_v23 = vld [vmem:[%s1774_s2 + $0x50] sm:$0xff]  ;;  %v1328_v26 = vld [vmem:[%s1774_s2 + $0x88] sm:$0xff]  ;;  %s1450_s14 = smov 32   ;;  %s1128_s23 = sshll.u32 %s1782_s10, 4  ;;  %s1129_s23 = int_to_ptr.hbm [resolvable:$true] %s1128_s23 }
  0x11   :  { %358 = vmatpush.bf16.msra.mxu3 %v1339_v16  ;;  %v1338_v20 = vld [vmem:[%s1774_s2 + $0xd8] sm:$0xff]  ;;  %v1337_v24 = vld [vmem:[%s1774_s2 + $0xd0] sm:$0xff]  ;;  %v1320_v27 = vld [vmem:[%s1774_s2 + $0x48] sm:$0xff]  ;;  %s1452_s24 = smov 128   ;;  %s1453_s25 = smov 8  }
  0x12   :  { %320 = vmatpush.bf16.msra.mxu0 %v1314_v17  ;;  %v1336_v28 = vld [vmem:[%s1774_s2 + $0xc8] sm:$0xff]  ;;  %v1311_v29 = vld [vmem:[%s1774_s2] sm:$0xff]  ;;  %v46_v34 = vld.sshfl [vmem:[#allocation1 + $0x10] sm:$0xff pattern:$0x73625140] }
  0x13   :  { %346 = vmatpush.bf16.msra.mxu2 %v1330_v18  ;;  %v1327_v30 = vld [vmem:[%s1774_s2 + $0x80] sm:$0xff]  ;;  %v45_v35 = vld.sshfl [vmem:[#allocation1 + $0x8] sm:$0xff pattern:$0x73625140]  ;;  %v54_v39 = vpack.c.bf16 %v46_v34, %v46_v34  ;;  %v1630_v48 = vld [vmem:[%s1778_s6 + $0x18] sm:$0xff] }
  0x14   :  { %333 = vmatpush.bf16.msra.mxu1 %v1322_v19  ;;  %v1319_v31 = vld [vmem:[%s1774_s2 + $0x40] sm:$0xff]  ;;  %v47_v36 = vld.sshfl [vmem:[#allocation1 + $0x18] sm:$0xff pattern:$0x73625140]  ;;  %v1344_v37 = vld [vmem:[%s1775_s3 + $0x8] sm:$0xff]  ;;  %v53_v40 = vpack.c.bf16 %v45_v35, %v45_v35 }
  0x15   :  { %359 = vmatpush.bf16.msra.mxu3 %v1338_v20  ;;  %v1335_v32 = vld [vmem:[%s1774_s2 + $0xc0] sm:$0xff]  ;;  %v55_v41 = vpack.c.bf16 %v47_v36, %v47_v36  ;;  %v369_v44 = vld [vmem:[%s1773_s1 + $0x8] sm:$0xff]  ;;  %v1638_v49 = vld [vmem:[%s1778_s6 + $0x10] sm:$0xff] }
  0x16   :  { %321 = vmatpush.bf16.msra.mxu0 %v1313_v21  ;;  %v44_v33 = vld.sshfl [vmem:[#allocation1] sm:$0xff pattern:$0x73625140]  ;;  %v1346_v46 = vld [vmem:[%s1777_s5 + $0x8] sm:$0xff] }
  0x17   :  { %347 = vmatpush.bf16.msra.mxu2 %v1329_v22  ;;  %v52_v38 = vpack.c.bf16 %v44_v33, %v44_v33  ;;  %v1343_v42 = vld [vmem:[%s1775_s3] sm:$0xff]  ;;  %v1643_v50 = vld [vmem:[%s1778_s6 + $0x8] sm:$0xff] }
  0x18   :  { %334 = vmatpush.bf16.msra.mxu1 %v1321_v23  ;;  %v368_v43 = vld [vmem:[%s1773_s1] sm:$0xff] }
  0x19   :  { %360 = vmatpush.bf16.msra.mxu3 %v1337_v24  ;;  %v370_v45 = vpack.c.bf16 %v369_v44, %v368_v43  ;;  %v1345_v47 = vld [vmem:[%s1777_s5] sm:$0xff] }
  0x1a   :  { %322 = vmatpush.bf16.msra.mxu0 %v1312_v25  ;;  %v1654_v51 = vld [vmem:[%s1778_s6] sm:$0xff] }
  0x1b   :  { %348 = vmatpush.bf16.msra.mxu2 %v1328_v26  ;;  %v1355_v53 = vld [vmem:[%s1776_s4] ss:$0 sm:$0xff] }
  0x1c   :  { %335 = vmatpush.bf16.msra.mxu1 %v1320_v27  ;;  %v1356_v7 = vld [vmem:[%s1779_s7] ss:$0 sm:$0xff]  ;;  %s1449_s7 = smov 64  }
  0x1d   :  { %361 = vmatpush.bf16.msra.mxu3 %v1336_v28 }
  0x1e   :  { %323 = vmatpush.bf16.msra.mxu0 %v1311_v29 }
  0x1f   :  { %349 = vmatpush.bf16.msra.mxu2 %v1327_v30 }
  0x20   :  { %336 = vmatpush.bf16.msra.mxu1 %v1319_v31 }
  0x21   :  { %362 = vmatpush.bf16.msra.mxu3 %v1335_v32  ;;  %324 = vmatmul.bf16.vlgmr.msra.gmra.mxu0 %v52_v38 }
  0x22   :  { %397 = vmatpush.bf16.msrb.mxu0 %v1344_v37  ;;  %350 = vmatmul.bf16.vlgmr.msra.gmra.mxu2 %v54_v39 }
  0x23   :  { %337 = vmatmul.bf16.vlgmr.msra.gmra.mxu1 %v53_v40  ;;  %465 = vmatpush.bf16.msrb.mxu2 %v1346_v46 }
  0x24   :  { %363 = vmatmul.bf16.vlgmr.msra.gmra.mxu3 %v55_v41  ;;  %435 = vmatpush.bf16.msrb.mxu1 %v1346_v46 }
  0x25   :  { %492 = vmatpush.msrb.mxu3 %v1630_v48 }
  0x26   :  { %398 = vmatpush.bf16.msrb.mxu0 %v1343_v42 }
  0x27   :  { %466 = vmatpush.bf16.msrb.mxu2 %v1345_v47  ;;  %493 = vmatpush.msrb.mxu3 %v1638_v49 }
  0x28   :  { %436 = vmatpush.bf16.msrb.mxu1 %v1345_v47 }
  0x29   :  { %494 = vmatpush.msrb.mxu3 %v1643_v50 }
  0x2a   :  { %625 = vmatpush.msra.mxu0 %v1630_v48 }
  0x2b   :  { %495 = vmatpush.msrb.mxu3 %v1654_v51 }
  0x2c   :  { %695 = vmatpush.msra.mxu1 %v1630_v48  ;;  %626 = vmatpush.msra.mxu0 %v1638_v49 }
  0x2d   :  { %555 = vmatpush.msra.mxu3 %v1630_v48 }
  0x2e   :  { %696 = vmatpush.msra.mxu1 %v1638_v49  ;;  %627 = vmatpush.msra.mxu0 %v1643_v50 }
  0x2f   :  { %556 = vmatpush.msra.mxu3 %v1638_v49 }
  0x30   :  { %697 = vmatpush.msra.mxu1 %v1643_v50  ;;  %628 = vmatpush.msra.mxu0 %v1654_v51 }
  0x31   :  { %1276 = vmatmul.msk.bf16.vlgmr.msrb.gmra.mxu0 %vm387_vm0, %v370_v45  ;;  %557 = vmatpush.msra.mxu3 %v1643_v50 }
  0x32   :  { %698 = vmatpush.msra.mxu1 %v1654_v51  ;;  %901 = vmatpush.msrb.mxu0 %v1630_v48 }
  0x33   :  { %558 = vmatpush.msra.mxu3 %v1654_v51 }
  0x34   :  { %496 = vmatmul.f32.vlgmr.msrb.gmra.mxu3 %v1448_v52  ;;  %902 = vmatpush.msrb.mxu0 %v1638_v49 }
  0x35   :  { %765 = vmatpush.msrb.mxu3 %v1630_v48 }
  0x36   :  { %903 = vmatpush.msrb.mxu0 %v1643_v50 }
  0x37   :  { %766 = vmatpush.msrb.mxu3 %v1638_v49 }
  0x38   :  { %904 = vmatpush.msrb.mxu0 %v1654_v51 }
  0x39   :  { %767 = vmatpush.msrb.mxu3 %v1643_v50 }
  0x3b   :  { %768 = vmatpush.msrb.mxu3 %v1654_v51 }
  0x9e   :  { %v325_v54 = vpop.f32.mrf.mxu0 }
  0x9f   :  { %v326_v55 = vadd.f32 %v1355_v53, %v325_v54 }
  0xa0   :  { %v338_v56 = vpop.f32.mrf.mxu1 }
  0xa1   :  { %v339_v57 = vadd.f32 %v338_v56, %v326_v55 }
  0xa5   :  { %v351_v58 = vpop.f32.mrf.mxu2 }
  0xa6   :  { %v352_v59 = vadd.f32 %v351_v58, %v339_v57  ;;  %v327_v61 = vpop.f32.mrf.mxu0 }
  0xa7   :  { %v364_v60 = vpop.f32.mrf.mxu3 }
  0xa8   :  { %v365_v62 = vadd.f32 %v364_v60, %v352_v59  ;;  %v340_v63 = vpop.f32.mrf.mxu1 }
  0xaa   :  { %v405_v0 = vpack.c.bf16 %v365_v62, %v365_v62 }
  0xac   :  { %1285 = vmatmul.msk.bf16.vlgmr.msrb.gmra.mxu1 %vm387_vm0, %v405_v0 }
  0xad   :  { %v353_v1 = vpop.f32.mrf.mxu2  ;;  %971 = vmatpush.msrb.mxu1 %v1630_v48 }
  0xae   :  { %v400_v3 = vpop.f32.mrf.mxu0 }
  0xaf   :  { %v366_v2 = vpop.f32.mrf.mxu3  ;;  %972 = vmatpush.msrb.mxu1 %v1638_v49 }
  0xb1   :  { %973 = vmatpush.msrb.mxu1 %v1643_v50 }
  0xb3   :  { %974 = vmatpush.msrb.mxu1 %v1654_v51 }
  0xb6   :  { %v402_v4 = vpop.f32.mrf.mxu0 }
  0xb7   :  { %v442_v5 = vpack.c.bf16 %v402_v4, %v400_v3  ;;  %v497_v17 = vpop.f32.mrf.mxu3 }
  0xb9   :  { %1286 = vmatmul.msk.bf16.vlgmr.msrb.gmra.mxu2 %vm387_vm0, %v442_v5 }
 0x129   :  { %v438_v6 = vpop.f32.mrf.mxu1 }
 0x12a   :  { %v439_v8 = vadd.f32 %v1356_v7, %v438_v6 }
 0x12c   :  { %v444_v10 = vrot.slane %v439_v8, 6  ;;  %v446_v11 = vrot.slane %v439_v8, 4  ;;  %v448_v14 = vrot.slane %v439_v8, 2 }
 0x12e   :  { %v451_v12 = vsel %vm450_vm1, %v439_v8, %v444_v10 }
 0x12f   :  { %v453_v13 = vsel %vm452_vm2, %v451_v12, %v446_v11 }
 0x130   :  { %v1686_v15 = vsel %vm454_vm3, %v453_v13, %v448_v14 }
 0x131   :  { %v440_v9 = vpop.f32.mrf.mxu1 }
 0x13c   :  { %v468_v16 = vpop.f32.mrf.mxu2 }
 0x13d   :  { %v1689_v18 = vadd.f32 %v468_v16, %v1686_v15 }
 0x13f   :  { %v500_v19 = vadd.f32 %v497_v17, %v1689_v18 }
 0x141   :  { %1358 = vtanh.f32 %v500_v19  ;;  %v1287_v21 = vmul.f32 -1.442695, %v500_v19 }
 0x143   :  { %1360 = vpow2.f32 %v1287_v21 }
 0x147   :  { %v1359_v20 = vpop.eup %1358 }
 0x148   :  { %523 = vrot.lane.b32.xlu0 %v1359_v20, %s1449_s7 }
 0x149   :  { %v1361_v22 = vpop.eup %1360 }
 0x14a   :  { %v504_v23 = vadd.f32 1.0, %v1361_v22 }
 0x14c   :  { %1362 = vrcp.f32 %v504_v23  ;;  %v516_v29 = vand.u32 2147483648, %v504_v23  ;;  %vm510_vm5 = vweird.f32 %v504_v23  ;;  %v514_v30 = vand.u32 2147483647, %v504_v23 }
 0x14e   :  { %v517_v32 = vor.u32 1.1754944e-38, %v516_v29  ;;  %vm515_vm7 = vcmp.eq.f32.partialorder %v514_v30, 8.507059e+37 }
 0x152   :  { %v1363_v24 = vpop.eup %1362 }
 0x153   :  { %v506_v25 = vmul.f32 %v1363_v24, %v504_v23  ;;  %vm511_vm4 = vweird.f32 %v1363_v24 }
 0x154   :  { %vm512_vm6 = vmor %vm510_vm5, %vm511_vm4  ;;  %vm1051_vm4 = vcmask 1040384  }
 0x155   :  { %v507_v26 = vsub.f32 1.0, %v506_v25 }
 0x157   :  { %v508_v27 = vmul.f32 %v1363_v24, %v507_v26 }
 0x159   :  { %v509_v28 = vadd.f32 %v1363_v24, %v508_v27 }
 0x15b   :  { %v513_v31 = vsel %vm512_vm6, %v1363_v24, %v509_v28 }
 0x15c   :  { %v518_v34 = vsel %vm515_vm7, %v517_v32, %v513_v31 }
 0x15d   :  { %v521_v36 = vmul.f32 0.0, %v518_v34 }
 0x1ba   :  { %v524_v33 = vpop.permute.xlu0 %523 }
 0x1bb   :  { %v526_v35 = vmul.f32 %v524_v33, %v518_v34 }
 0x1bd   :  { %528 = vrot.lane.b32.xlu0 %v526_v35, %s1450_s14 }
 0x22f   :  { %v529_v37 = vpop.permute.xlu0 %528 }
 0x230   :  { %v531_v38 = vadd.f32 %v529_v37, %v521_v36 }
 0x232   :  { %1364 = vtanh.f32 %v531_v38  ;;  %v588_v62 = vrot.slane %v531_v38, 6 }
 0x238   :  { %v1365_v39 = vpop.eup %1364 }
 0x239   :  { %534 = vrot.lane.b32.xlu1 %v1365_v39, %s1449_s7 }
 0x2ab   :  { %v535_v40 = vpop.permute.xlu1 %534 }
 0x2ac   :  { %v1695_v41 = vmul.f32 %v535_v40, %v518_v34 }
 0x2ae   :  { %539 = vrot.lane.b32.xlu1 %v1695_v41, %s1450_s14  ;;  %v1038_v36 = vrot.slane %v1695_v41, 1 }
 0x320   :  { %v540_v42 = vpop.permute.xlu1 %539 }
 0x321   :  { %1288 = vmatmul.msk.f32.vlgmr.msra.gmra.mxu3 %vm387_vm0, %v540_v42 }
 0x322   :  { %831 = vmatpush.msra.mxu3 %v1630_v48 }
 0x324   :  { %832 = vmatpush.msra.mxu3 %v1638_v49 }
 0x326   :  { %833 = vmatpush.msra.mxu3 %v1643_v50 }
 0x328   :  { %834 = vmatpush.msra.mxu3 %v1654_v51 }
 0x3a4   :  { %v560_v43 = vpop.f32.mrf.mxu3 }
 0x3a5   :  { %v564_v44 = vrot.slane %v560_v43, 6 }
 0x3a7   :  { %v566_v45 = vadd.f32 %v564_v44, %v1689_v18 }
 0x3a9   :  { %1366 = vtanh.f32 %v566_v45  ;;  %v1289_v47 = vmul.f32 -1.442695, %v566_v45 }
 0x3ab   :  { %1368 = vpow2.f32 %v1289_v47 }
 0x3af   :  { %v1367_v46 = vpop.eup %1366 }
 0x3b0   :  { %592 = vrot.lane.b32.xlu2 %v1367_v46, %s1449_s7 }
 0x3b1   :  { %v1369_v52 = vpop.eup %1368 }
 0x3b2   :  { %v570_v53 = vadd.f32 1.0, %v1369_v52 }
 0x3b4   :  { %1370 = vrcp.f32 %v570_v53  ;;  %v582_v51 = vand.u32 2147483648, %v570_v53  ;;  %vm576_vm9 = vweird.f32 %v570_v53  ;;  %v580_v56 = vand.u32 2147483647, %v570_v53 }
 0x3b6   :  { %v583_v58 = vor.u32 1.1754944e-38, %v582_v51  ;;  %vm581_vm11 = vcmp.eq.f32.partialorder %v580_v56, 8.507059e+37 }
 0x3ba   :  { %v1371_v48 = vpop.eup %1370 }
 0x3bb   :  { %v572_v54 = vmul.f32 %v1371_v48, %v570_v53  ;;  %vm577_vm8 = vweird.f32 %v1371_v48 }
 0x3bc   :  { %vm578_vm10 = vmor %vm576_vm9, %vm577_vm8  ;;  %vm1054_vm8 = vcmask 1042432  }
 0x3bd   :  { %v573_v49 = vsub.f32 1.0, %v572_v54 }
 0x3bf   :  { %v574_v55 = vmul.f32 %v1371_v48, %v573_v49 }
 0x3c1   :  { %v575_v50 = vadd.f32 %v1371_v48, %v574_v55 }
 0x3c3   :  { %v579_v57 = vsel %vm578_vm10, %v1371_v48, %v575_v50 }
 0x3c4   :  { %v584_v60 = vsel %vm581_vm11, %v583_v58, %v579_v57 }
 0x3c5   :  { %v590_v63 = vmul.f32 %v588_v62, %v584_v60 }
 0x40a   :  { %v593_v59 = vpop.permute.xlu2 %592 }
 0x40b   :  { %v595_v61 = vmul.f32 %v593_v59, %v584_v60 }
 0x40d   :  { %597 = vrot.lane.b32.xlu2 %v595_v61, %s1450_s14 }
 0x467   :  { %v598_v0 = vpop.permute.xlu2 %597 }
 0x468   :  { %v600_v1 = vadd.f32 %v598_v0, %v590_v63 }
 0x46a   :  { %1372 = vtanh.f32 %v600_v1  ;;  %v658_v28 = vrot.slane %v600_v1, 6 }
 0x470   :  { %v1373_v2 = vpop.eup %1372 }
 0x471   :  { %603 = vrot.lane.b32.xlu0 %v1373_v2, %s1449_s7 }
 0x4e3   :  { %v604_v3 = vpop.permute.xlu0 %603 }
 0x4e4   :  { %v606_v4 = vmul.f32 %v604_v3, %v584_v60 }
 0x4e6   :  { %v608_v5 = vrot.slane %v606_v4, 2  ;;  %v1023_v33 = vrot.slane %v606_v4, 1 }
 0x4e8   :  { %609 = vrot.lane.b32.xlu1 %v608_v5, %s1450_s14  ;;  %v1052_v40 = vsel %vm1051_vm4, %v1695_v41, %v1023_v33  ;;  %v1062_v42 = vsel %vm1051_vm4, %v1038_v36, %v608_v5  ;;  %vm1057_vm4 = vcmask 1044480  }
 0x55a   :  { %v610_v6 = vpop.permute.xlu1 %609 }
 0x55b   :  { %1290 = vmatmul.msk.f32.vlgmr.msra.gmra.mxu0 %vm387_vm0, %v610_v6 }
 0x5d8   :  { %v630_v7 = vpop.f32.mrf.mxu0 }
 0x5d9   :  { %v634_v8 = vrot.slane %v630_v7, 4 }
 0x5db   :  { %v636_v9 = vadd.f32 %v634_v8, %v1689_v18 }
 0x5dd   :  { %1374 = vtanh.f32 %v636_v9  ;;  %v1291_v11 = vmul.f32 -1.442695, %v636_v9 }
 0x5df   :  { %1376 = vpow2.f32 %v1291_v11 }
 0x5e3   :  { %v1375_v10 = vpop.eup %1374 }
 0x5e4   :  { %662 = vrot.lane.b32.xlu2 %v1375_v10, %s1449_s7 }
 0x5e5   :  { %v1377_v12 = vpop.eup %1376 }
 0x5e6   :  { %v640_v13 = vadd.f32 1.0, %v1377_v12  ;;  %v470_v12 = vpop.f32.mrf.mxu2 }
 0x5e8   :  { %1378 = vrcp.f32 %v640_v13  ;;  %v652_v21 = vand.u32 2147483648, %v640_v13  ;;  %vm646_vm13 = vweird.f32 %v640_v13  ;;  %v650_v22 = vand.u32 2147483647, %v640_v13 }
 0x5ea   :  { %v653_v24 = vor.u32 1.1754944e-38, %v652_v21  ;;  %vm651_vm15 = vcmp.eq.f32.partialorder %v650_v22, 8.507059e+37 }
 0x5ee   :  { %v1379_v14 = vpop.eup %1378 }
 0x5ef   :  { %v642_v16 = vmul.f32 %v1379_v14, %v640_v13  ;;  %vm647_vm12 = vweird.f32 %v1379_v14  ;;  %v1727_v13 = vadd.f32 %v470_v12, %v1686_v15 }
 0x5f0   :  { %vm648_vm14 = vmor %vm646_vm13, %vm647_vm12 }
 0x5f1   :  { %v643_v17 = vsub.f32 1.0, %v642_v16 }
 0x5f3   :  { %v644_v19 = vmul.f32 %v1379_v14, %v643_v17 }
 0x5f5   :  { %v645_v20 = vadd.f32 %v1379_v14, %v644_v19 }
 0x5f7   :  { %v649_v23 = vsel %vm648_vm14, %v1379_v14, %v645_v20 }
 0x5f8   :  { %v654_v26 = vsel %vm651_vm15, %v653_v24, %v649_v23 }
 0x5f9   :  { %v660_v29 = vmul.f32 %v658_v28, %v654_v26 }
 0x63e   :  { %v663_v25 = vpop.permute.xlu2 %662 }
 0x63f   :  { %v665_v27 = vmul.f32 %v663_v25, %v654_v26 }
 0x641   :  { %667 = vrot.lane.b32.xlu0 %v665_v27, %s1450_s14 }
 0x6b3   :  { %v668_v30 = vpop.permute.xlu0 %667 }
 0x6b4   :  { %v670_v31 = vadd.f32 %v668_v30, %v660_v29 }
 0x6b6   :  { %1380 = vtanh.f32 %v670_v31  ;;  %v728_v63 = vrot.slane %v670_v31, 6 }
 0x6bc   :  { %v1381_v32 = vpop.eup %1380 }
 0x6bd   :  { %673 = vrot.lane.b32.xlu1 %v1381_v32, %s1449_s7 }
 0x72f   :  { %v674_v34 = vpop.permute.xlu1 %673 }
 0x730   :  { %v676_v35 = vmul.f32 %v674_v34, %v654_v26 }
 0x732   :  { %v1025_v37 = vrot.slane %v676_v35, 2  ;;  %v1041_v38 = vrot.slane %v676_v35, 3  ;;  %v678_v39 = vrot.slane %v676_v35, 4 }
 0x734   :  { %v1053_v43 = vsel %vm450_vm1, %v1052_v40, %v1025_v37  ;;  %v1063_v44 = vsel %vm450_vm1, %v1062_v42, %v1041_v38  ;;  %679 = vrot.lane.b32.xlu2 %v678_v39, %s1450_s14 }
 0x78e   :  { %v680_v45 = vpop.permute.xlu2 %679 }
 0x78f   :  { %1292 = vmatmul.msk.f32.vlgmr.msra.gmra.mxu1 %vm387_vm0, %v680_v45 }
 0x80c   :  { %v700_v46 = vpop.f32.mrf.mxu1 }
 0x80d   :  { %v704_v47 = vrot.slane %v700_v46, 2 }
 0x80f   :  { %v706_v52 = vadd.f32 %v704_v47, %v1689_v18 }
 0x811   :  { %1382 = vtanh.f32 %v706_v52  ;;  %v1293_v48 = vmul.f32 -1.442695, %v706_v52 }
 0x813   :  { %1384 = vpow2.f32 %v1293_v48 }
 0x817   :  { %v1383_v53 = vpop.eup %1382 }
 0x818   :  { %732 = vrot.lane.b32.xlu0 %v1383_v53, %s1449_s7 }
 0x819   :  { %v1385_v41 = vpop.eup %1384 }
 0x81a   :  { %v710_v54 = vadd.f32 1.0, %v1385_v41 }
 0x81c   :  { %1386 = vrcp.f32 %v710_v54  ;;  %v722_v57 = vand.u32 2147483648, %v710_v54  ;;  %vm716_vm5 = vweird.f32 %v710_v54  ;;  %v720_v58 = vand.u32 2147483647, %v710_v54 }
 0x81e   :  { %v723_v59 = vor.u32 1.1754944e-38, %v722_v57  ;;  %vm721_vm7 = vcmp.eq.f32.partialorder %v720_v58, 8.507059e+37 }
 0x822   :  { %v1387_v49 = vpop.eup %1386 }
 0x823   :  { %v712_v55 = vmul.f32 %v1387_v49, %v710_v54  ;;  %vm717_vm1 = vweird.f32 %v1387_v49 }
 0x824   :  { %vm718_vm6 = vmor %vm716_vm5, %vm717_vm1 }
 0x825   :  { %v713_v50 = vsub.f32 1.0, %v712_v55 }
 0x827   :  { %v714_v51 = vmul.f32 %v1387_v49, %v713_v50 }
 0x829   :  { %v715_v56 = vadd.f32 %v1387_v49, %v714_v51 }
 0x82b   :  { %v719_v18 = vsel %vm718_vm6, %v1387_v49, %v715_v56 }
 0x82c   :  { %v724_v61 = vsel %vm721_vm7, %v723_v59, %v719_v18 }
 0x82d   :  { %v730_v0 = vmul.f32 %v728_v63, %v724_v61 }
 0x88a   :  { %v733_v60 = vpop.permute.xlu0 %732 }
 0x88b   :  { %v735_v62 = vmul.f32 %v733_v60, %v724_v61 }
 0x88d   :  { %737 = vrot.lane.b32.xlu1 %v735_v62, %s1450_s14 }
 0x8ff   :  { %v738_v1 = vpop.permute.xlu1 %737 }
 0x900   :  { %v740_v2 = vadd.f32 %v738_v1, %v730_v0 }
 0x902   :  { %1388 = vtanh.f32 %v740_v2  ;;  %v795_v33 = vrot.slane %v740_v2, 6 }
 0x908   :  { %v1389_v3 = vpop.eup %1388 }
 0x909   :  { %743 = vrot.lane.b32.xlu2 %v1389_v3, %s1449_s7 }
 0x963   :  { %v744_v4 = vpop.permute.xlu2 %743 }
 0x964   :  { %v746_v5 = vmul.f32 %v744_v4, %v724_v61 }
 0x966   :  { %v1027_v6 = vrot.slane %v746_v5, 3  ;;  %v1043_v7 = vrot.slane %v746_v5, 4  ;;  %v748_v8 = vrot.slane %v746_v5, 6 }
 0x968   :  { %v1055_v9 = vsel %vm1054_vm8, %v1053_v43, %v1027_v6  ;;  %v1064_v10 = vsel %vm1054_vm8, %v1063_v44, %v1043_v7  ;;  %749 = vrot.lane.b32.xlu0 %v748_v8, %s1450_s14 }
 0x9da   :  { %v750_v11 = vpop.permute.xlu0 %749 }
 0x9db   :  { %1294 = vmatmul.msk.f32.vlgmr.msrb.gmra.mxu3 %vm387_vm0, %v750_v11 }
 0xa5e   :  { %v770_v14 = vpop.f32.mrf.mxu3 }
 0xa5f   :  { %v773_v16 = vadd.f32 %v770_v14, %v1727_v13 }
 0xa61   :  { %1390 = vtanh.f32 %v773_v16  ;;  %v1295_v19 = vmul.f32 -1.442695, %v773_v16 }
 0xa63   :  { %1392 = vpow2.f32 %v1295_v19 }
 0xa67   :  { %v1391_v17 = vpop.eup %1390 }
 0xa68   :  { %799 = vrot.lane.b32.xlu1 %v1391_v17, %s1449_s7 }
 0xa69   :  { %v1393_v20 = vpop.eup %1392 }
 0xa6a   :  { %v777_v21 = vadd.f32 1.0, %v1393_v20 }
 0xa6c   :  { %1394 = vrcp.f32 %v777_v21  ;;  %v789_v15 = vand.u32 2147483648, %v777_v21  ;;  %vm783_vm10 = vweird.f32 %v777_v21  ;;  %v787_v27 = vand.u32 2147483647, %v777_v21 }
 0xa6e   :  { %v790_v29 = vor.u32 1.1754944e-38, %v789_v15  ;;  %vm788_vm12 = vcmp.eq.f32.partialorder %v787_v27, 8.507059e+37 }
 0xa72   :  { %v1395_v22 = vpop.eup %1394 }
 0xa73   :  { %v779_v23 = vmul.f32 %v1395_v22, %v777_v21  ;;  %vm784_vm9 = vweird.f32 %v1395_v22 }
 0xa74   :  { %vm785_vm11 = vmor %vm783_vm10, %vm784_vm9 }
 0xa75   :  { %v780_v24 = vsub.f32 1.0, %v779_v23 }
 0xa77   :  { %v781_v25 = vmul.f32 %v1395_v22, %v780_v24 }
 0xa79   :  { %v782_v26 = vadd.f32 %v1395_v22, %v781_v25 }
 0xa7b   :  { %v786_v28 = vsel %vm785_vm11, %v1395_v22, %v782_v26  ;;  %vm1060_vm11 = vcmask 1046528  }
 0xa7c   :  { %v791_v31 = vsel %vm788_vm12, %v790_v29, %v786_v28 }
 0xa7d   :  { %v797_v34 = vmul.f32 %v795_v33, %v791_v31 }
 0xada   :  { %v800_v30 = vpop.permute.xlu1 %799 }
 0xadb   :  { %v802_v32 = vmul.f32 %v800_v30, %v791_v31 }
 0xadd   :  { %804 = vrot.lane.b32.xlu2 %v802_v32, %s1450_s14 }
 0xb37   :  { %v805_v35 = vpop.permute.xlu2 %804 }
 0xb38   :  { %v807_v36 = vadd.f32 %v805_v35, %v797_v34 }
 0xb3a   :  { %1396 = vtanh.f32 %v807_v36  ;;  %v864_v63 = vrot.slane %v807_v36, 6 }
 0xb40   :  { %v1397_v37 = vpop.eup %1396 }
 0xb41   :  { %810 = vrot.lane.b32.xlu0 %v1397_v37, %s1449_s7 }
 0xbb3   :  { %v811_v38 = vpop.permute.xlu0 %810 }
 0xbb4   :  { %v813_v39 = vmul.f32 %v811_v38, %v791_v31 }
 0xbb6   :  { %v1029_v40 = vrot.slane %v813_v39, 4  ;;  %v1045_v42 = vrot.slane %v813_v39, 5  ;;  %815 = vrot.lane.b32.xlu1 %v813_v39, %s1450_s14 }
 0xbb8   :  { %v1065_v43 = vsel %vm452_vm2, %v1064_v10, %v1045_v42  ;;  %v1056_v44 = vsel %vm452_vm2, %v1055_v9, %v1029_v40 }
 0xc28   :  { %v816_v45 = vpop.permute.xlu1 %815 }
 0xc29   :  { %1296 = vmatmul.msk.f32.vlgmr.msra.gmra.mxu3 %vm387_vm0, %v816_v45 }
 0xcac   :  { %v836_v46 = vpop.f32.mrf.mxu3 }
 0xcad   :  { %v840_v47 = vrot.slane %v836_v46, 6 }
 0xcaf   :  { %v842_v52 = vadd.f32 %v840_v47, %v1727_v13 }
 0xcb1   :  { %1398 = vtanh.f32 %v842_v52  ;;  %v1297_v48 = vmul.f32 -1.442695, %v842_v52 }
 0xcb3   :  { %1400 = vpow2.f32 %v1297_v48 }
 0xcb7   :  { %v1399_v53 = vpop.eup %1398 }
 0xcb8   :  { %868 = vrot.lane.b32.xlu2 %v1399_v53, %s1449_s7 }
 0xcb9   :  { %v1401_v41 = vpop.eup %1400 }
 0xcba   :  { %v846_v54 = vadd.f32 1.0, %v1401_v41 }
 0xcbc   :  { %1402 = vrcp.f32 %v846_v54  ;;  %v858_v57 = vand.u32 2147483648, %v846_v54  ;;  %vm852_vm13 = vweird.f32 %v846_v54  ;;  %v856_v58 = vand.u32 2147483647, %v846_v54 }
 0xcbe   :  { %v859_v59 = vor.u32 1.1754944e-38, %v858_v57  ;;  %vm857_vm15 = vcmp.eq.f32.partialorder %v856_v58, 8.507059e+37 }
 0xcc2   :  { %v1403_v49 = vpop.eup %1402 }
 0xcc3   :  { %v848_v55 = vmul.f32 %v1403_v49, %v846_v54  ;;  %vm853_vm2 = vweird.f32 %v1403_v49 }
 0xcc4   :  { %vm854_vm14 = vmor %vm852_vm13, %vm853_vm2 }
 0xcc5   :  { %v849_v50 = vsub.f32 1.0, %v848_v55 }
 0xcc7   :  { %v850_v51 = vmul.f32 %v1403_v49, %v849_v50 }
 0xcc9   :  { %v851_v56 = vadd.f32 %v1403_v49, %v850_v51 }
 0xccb   :  { %v855_v18 = vsel %vm854_vm14, %v1403_v49, %v851_v56 }
 0xccc   :  { %v860_v61 = vsel %vm857_vm15, %v859_v59, %v855_v18 }
 0xccd   :  { %v866_v0 = vmul.f32 %v864_v63, %v860_v61 }
 0xd12   :  { %v869_v60 = vpop.permute.xlu2 %868 }
 0xd13   :  { %v871_v62 = vmul.f32 %v869_v60, %v860_v61 }
 0xd15   :  { %873 = vrot.lane.b32.xlu0 %v871_v62, %s1450_s14 }
 0xd87   :  { %v874_v1 = vpop.permute.xlu0 %873 }
 0xd88   :  { %v876_v2 = vadd.f32 %v874_v1, %v866_v0 }
 0xd8a   :  { %1404 = vtanh.f32 %v876_v2  ;;  %v934_v33 = vrot.slane %v876_v2, 6 }
 0xd90   :  { %v1405_v3 = vpop.eup %1404 }
 0xd91   :  { %879 = vrot.lane.b32.xlu1 %v1405_v3, %s1449_s7 }
 0xe03   :  { %v880_v4 = vpop.permute.xlu1 %879 }
 0xe04   :  { %v882_v5 = vmul.f32 %v880_v4, %v860_v61 }
 0xe06   :  { %v1031_v6 = vrot.slane %v882_v5, 5  ;;  %v1047_v7 = vrot.slane %v882_v5, 6  ;;  %v884_v8 = vrot.slane %v882_v5, 2 }
 0xe08   :  { %885 = vrot.lane.b32.xlu2 %v884_v8, %s1450_s14  ;;  %v1066_v9 = vsel %vm1057_vm4, %v1065_v43, %v1047_v7  ;;  %v1058_v10 = vsel %vm1057_vm4, %v1056_v44, %v1031_v6 }
 0xe62   :  { %v886_v11 = vpop.permute.xlu2 %885 }
 0xe63   :  { %1298 = vmatmul.msk.f32.vlgmr.msrb.gmra.mxu0 %vm387_vm0, %v886_v11 }
 0xee0   :  { %v906_v12 = vpop.f32.mrf.mxu0 }
 0xee1   :  { %v910_v14 = vrot.slane %v906_v12, 4 }
 0xee3   :  { %v912_v16 = vadd.f32 %v910_v14, %v1727_v13 }
 0xee5   :  { %1406 = vtanh.f32 %v912_v16  ;;  %v1299_v19 = vmul.f32 -1.442695, %v912_v16 }
 0xee7   :  { %1408 = vpow2.f32 %v1299_v19  ;;  %v1357_v19 = vld [vmem:[%s1781_s9] ss:$0 sm:$0xff] }
 0xeeb   :  { %v1407_v17 = vpop.eup %1406 }
 0xeec   :  { %938 = vrot.lane.b32.xlu0 %v1407_v17, %s1449_s7 }
 0xeed   :  { %v1409_v20 = vpop.eup %1408 }
 0xeee   :  { %v916_v21 = vadd.f32 1.0, %v1409_v20 }
 0xef0   :  { %1410 = vrcp.f32 %v916_v21  ;;  %v928_v15 = vand.u32 2147483648, %v916_v21  ;;  %vm922_vm5 = vweird.f32 %v916_v21  ;;  %v926_v27 = vand.u32 2147483647, %v916_v21 }
 0xef2   :  { %v929_v29 = vor.u32 1.1754944e-38, %v928_v15  ;;  %vm927_vm7 = vcmp.eq.f32.partialorder %v926_v27, 8.507059e+37 }
 0xef6   :  { %v1411_v22 = vpop.eup %1410 }
 0xef7   :  { %v918_v23 = vmul.f32 %v1411_v22, %v916_v21  ;;  %vm923_vm1 = vweird.f32 %v1411_v22 }
 0xef8   :  { %vm924_vm6 = vmor %vm922_vm5, %vm923_vm1 }
 0xef9   :  { %v919_v24 = vsub.f32 1.0, %v918_v23 }
 0xefb   :  { %v920_v25 = vmul.f32 %v1411_v22, %v919_v24 }
 0xefd   :  { %v921_v26 = vadd.f32 %v1411_v22, %v920_v25 }
 0xeff   :  { %v925_v28 = vsel %vm924_vm6, %v1411_v22, %v921_v26 }
 0xf00   :  { %v930_v31 = vsel %vm927_vm7, %v929_v29, %v925_v28 }
 0xf01   :  { %v936_v34 = vmul.f32 %v934_v33, %v930_v31 }
 0xf5e   :  { %v939_v30 = vpop.permute.xlu0 %938 }
 0xf5f   :  { %v941_v32 = vmul.f32 %v939_v30, %v930_v31 }
 0xf61   :  { %943 = vrot.lane.b32.xlu1 %v941_v32, %s1450_s14 }
 0xfd3   :  { %v944_v35 = vpop.permute.xlu1 %943 }
 0xfd4   :  { %v946_v36 = vadd.f32 %v944_v35, %v936_v34 }
 0xfd6   :  { %1412 = vtanh.f32 %v946_v36  ;;  %v1004_v63 = vrot.slane %v946_v36, 6 }
 0xfdc   :  { %v1413_v37 = vpop.eup %1412 }
 0xfdd   :  { %949 = vrot.lane.b32.xlu2 %v1413_v37, %s1449_s7 }
0x1037   :  { %v950_v38 = vpop.permute.xlu2 %949 }
0x1038   :  { %v952_v39 = vmul.f32 %v950_v38, %v930_v31 }
0x103a   :  { %v1033_v40 = vrot.slane %v952_v39, 6  ;;  %v1049_v42 = vrot.slane %v952_v39, 7  ;;  %v954_v43 = vrot.slane %v952_v39, 4 }
0x103c   :  { %955 = vrot.lane.b32.xlu0 %v954_v43, %s1450_s14  ;;  %v1067_v44 = vsel %vm454_vm3, %v1066_v9, %v1049_v42  ;;  %v1059_v45 = vsel %vm454_vm3, %v1058_v10, %v1033_v40  ;;  %v1348_v9 = vld [vmem:[%s1780_s8 + $0x8] sm:$0xff]  ;;  %v1347_v10 = vld [vmem:[%s1780_s8] sm:$0xff]  ;;  %s1451_s8 = smov [#allocation3]  }
0x103d   :  { %1112 = vmatpush.bf16.msra.mxu2 %v1348_v9  ;;  %s1126_s20 = sshll.u32 %s1451_s8, 4  ;;  %s1127_s20 = int_to_ptr.vmem [resolvable:$true] %s1126_s20 }
0x1041   :  { %1113 = vmatpush.bf16.msra.mxu2 %v1347_v10 }
0x10ae   :  { %v956_v46 = vpop.permute.xlu0 %955 }
0x10af   :  { %1300 = vmatmul.msk.f32.vlgmr.msrb.gmra.mxu1 %vm387_vm0, %v956_v46 }
0x112c   :  { %v976_v47 = vpop.f32.mrf.mxu1 }
0x112d   :  { %v980_v52 = vrot.slane %v976_v47, 2 }
0x112f   :  { %v982_v53 = vadd.f32 %v980_v52, %v1727_v13 }
0x1131   :  { %1414 = vtanh.f32 %v982_v53  ;;  %v1301_v41 = vmul.f32 -1.442695, %v982_v53 }
0x1133   :  { %1416 = vpow2.f32 %v1301_v41 }
0x1137   :  { %v1415_v48 = vpop.eup %1414 }
0x1138   :  { %1008 = vrot.lane.b32.xlu1 %v1415_v48, %s1449_s7 }
0x1139   :  { %v1417_v54 = vpop.eup %1416 }
0x113a   :  { %v986_v49 = vadd.f32 1.0, %v1417_v54 }
0x113c   :  { %1418 = vrcp.f32 %v986_v49  ;;  %v998_v58 = vand.u32 2147483648, %v986_v49  ;;  %vm992_vm8 = vweird.f32 %v986_v49  ;;  %v996_v18 = vand.u32 2147483647, %v986_v49 }
0x113e   :  { %v999_v59 = vor.u32 1.1754944e-38, %v998_v58  ;;  %vm997_vm10 = vcmp.eq.f32.partialorder %v996_v18, 8.507059e+37 }
0x1142   :  { %v1419_v55 = vpop.eup %1418 }
0x1143   :  { %v988_v50 = vmul.f32 %v1419_v55, %v986_v49  ;;  %vm993_vm3 = vweird.f32 %v1419_v55 }
0x1144   :  { %vm994_vm9 = vmor %vm992_vm8, %vm993_vm3 }
0x1145   :  { %v989_v51 = vsub.f32 1.0, %v988_v50 }
0x1147   :  { %v990_v56 = vmul.f32 %v1419_v55, %v989_v51 }
0x1149   :  { %v991_v57 = vadd.f32 %v1419_v55, %v990_v56 }
0x114b   :  { %v995_v13 = vsel %vm994_vm9, %v1419_v55, %v991_v57 }
0x114c   :  { %v1000_v61 = vsel %vm997_vm10, %v999_v59, %v995_v13 }
0x114d   :  { %v1006_v0 = vmul.f32 %v1004_v63, %v1000_v61 }
0x11aa   :  { %v1009_v60 = vpop.permute.xlu1 %1008 }
0x11ab   :  { %v1011_v62 = vmul.f32 %v1009_v60, %v1000_v61 }
0x11ad   :  { %1013 = vrot.lane.b32.xlu2 %v1011_v62, %s1450_s14 }
0x1207   :  { %v1014_v1 = vpop.permute.xlu2 %1013 }
0x1208   :  { %v1016_v2 = vadd.f32 %v1014_v1, %v1006_v0 }
0x120a   :  { %1420 = vtanh.f32 %v1016_v2 }
0x1210   :  { %v1421_v3 = vpop.eup %1420 }
0x1211   :  { %1019 = vrot.lane.b32.xlu0 %v1421_v3, %s1449_s7 }
0x1283   :  { %v1020_v4 = vpop.permute.xlu0 %1019 }
0x1284   :  { %v1022_v5 = vmul.f32 %v1020_v4, %v1000_v61 }
0x1286   :  { %v1036_v6 = vrot.slane %v1022_v5, 7  ;;  %v1068_v7 = vsel %vm1060_vm11, %v1067_v44, %v1022_v5 }
0x1287   :  { %1073 = vrot.lane.b32.xlu2 %v1068_v7, %s1450_s14 }
0x1288   :  { %v1061_v8 = vsel %vm1060_vm11, %v1059_v45, %v1036_v6 }
0x1289   :  { %1071 = vrot.lane.b32.xlu1 %v1061_v8, %s1450_s14 }
0x12e1   :  { %v1074_v11 = vpop.permute.xlu2 %1073 }
0x12e2   :  { %1078 = vst.msk [vmem:[#allocation2 + $0x8] sm:$0xff] %vm387_vm0, %v1074_v11 }
0x12e9   :  { %v1080_v16 = vld [vmem:[#allocation2 + $0x8] sm:$0xff] }
0x12fb   :  { %v1072_v12 = vpop.permute.xlu1 %1071 }
0x12fc   :  { %1077 = vst.msk [vmem:[#allocation2] sm:$0xff] %vm387_vm0, %v1072_v12 }
0x1303   :  { %v1079_v14 = vld [vmem:[#allocation2] sm:$0xff] }
0x1304   :  { %v1081_v17 = vpack.c.bf16 %v1080_v16, %v1079_v14 }
0x1306   :  { %1310 = vmatmul.msk.bf16.vlgmr.msra.gmra.mxu2 %vm387_vm0, %v1081_v17 }
0x1389   :  { %v1115_v20 = vpop.f32.mrf.mxu2 }
0x138a   :  { %v1116_v21 = vadd.f32 %v1357_v19, %v1115_v20 }
0x138c   :  { %1120 = vst [vmem:[#allocation3] sm:$0xff] %v1116_v21 }
0x1391   :  { %v1117_v22 = vpop.f32.mrf.mxu2 }
0x1392   :  { %v1118_v23 = vadd.f32 %v1357_v19, %v1117_v22 }
0x1394   :  { %1121 = vst [vmem:[#allocation3 + $0x8] sm:$0xff] %v1118_v23 }
0x1395   :  { %1134 = dma.vmem_to_hbm [thread:$0]  %s1127_s20, 256, %s1129_s23, [#allocation4], %s1452_s24, %s1452_s24, %s1453_s25  }
0x1396   :  { %1446 = dma.done.wait [#allocation4], 256  }
0x1397   :  { %1447 = vsyncadd [#allocation4], 4294967040 }
0x1398   :  { %1139 = vsyncpa [#allocation4], 1 }

</bundles_post_ra>
